<compile_context>
chip_gen: v5e
topology: v5e:2x2
jax: 0.10.0
libtpu: 0.0.40
codegen_flags: <defaults>
</compile_context>

<pallas_src>
import functools

import jax
import jax.numpy as jnp
import numpy as np
from jax.experimental import pallas as pl
from jax.experimental.pallas import tpu as pltpu

LANE = 128


def _pad_to(x, target, axis):
    pad = [(0, 0)] * x.ndim
    pad[axis] = (0, target - x.shape[axis])
    return jnp.pad(x, pad)


def _rpad(v):
    return max(LANE, ((v + LANE - 1) // LANE) * LANE)


# ----------- Fused kernel: conv(im2col)+ReLU -> H-pool -> FC -> CTC head -----
def fused_backbone_neck_head_kernel(patch_ref, wc_ref, bc_ref,
                                    w1_ref, b1_ref, w2_ref, b2_ref,
                                    o_ref, *, nb, h, w):
    # patch_ref : (nb*h*w, Kpad)   pre-packed im2col patches (lane-dense)
    # wc_ref    : (Kpad, Cpad)     conv weight, HWIO flattened + zero-padded
    # bc_ref    : (1, Cpad)        f32
    # w1_ref    : (Cpad, Hidpad)   neck FC weight, pre-scaled by 1/H
    # b1_ref    : (1, Hidpad)      f32
    # w2_ref    : (Hidpad, NCpad)  CTC head weight
    # b2_ref    : (1, NCpad)       f32
    # o_ref     : (nb*w, NCpad)    CTC logits over the sequence (width) axis
    cp = wc_ref.shape[-1]

    # backbone: 3x3 SAME conv as one MXU matmul on pre-built patches
    feat = jnp.dot(patch_ref[...], wc_ref[...],
                   preferred_element_type=jnp.float32)          # (nb*h*w, cp)
    feat = jnp.maximum(feat + bc_ref[...], 0.0)                  # bias + ReLU, f32

    # neck: Im2Seq height-mean (1/H folded into w1 -> plain sum) + FC + ReLU
    seq = jnp.sum(feat.reshape(nb, h, w, cp), axis=1).reshape(nb * w, cp)
    hid = jnp.dot(seq.astype(w1_ref.dtype), w1_ref[...],
                  preferred_element_type=jnp.float32)
    hid = jnp.maximum(hid + b1_ref[...], 0.0)                    # (nb*w, Hidpad)

    # head: CTC linear (lane-dense padded class dim)
    logits = jnp.dot(hid.astype(w2_ref.dtype), w2_ref[...],
                     preferred_element_type=jnp.float32) + b2_ref[...]
    o_ref[...] = logits.astype(o_ref.dtype)


# ----------------------------------- Wrapper ---------------------------------
def base_model_forward(x_nchw, params, *, compute_dtype=jnp.float32):
    # compute_dtype=jnp.bfloat16 recommended on v6e / v7x (MXU operands only;
    # accumulation and elementwise stay f32).
    wconv, bconv, w1, b1, w2, b2 = params
    N, Cin, H, W = x_nchw.shape
    Cout = wconv.shape[-1]
    hidden = w1.shape[-1]
    nclass = w2.shape[-1]
    HW = H * W
    K = 9 * Cin

    Kp, Cp, Hidp, NCp = _rpad(K), _rpad(Cout), _rpad(hidden), _rpad(nclass)

    # ---- im2col in the wrapper: lane-dense (N*H*W, Kp) patch matrix ---------
    x = jnp.transpose(x_nchw, (0, 2, 3, 1))                       # NCHW -> NHWC
    xp = jnp.pad(x, ((0, 0), (1, 1), (1, 1), (0, 0)))             # SAME padding
    # column order ((kh*3 + kw)*Cin + ci) matches wconv HWIO flattening below.
    patches = jnp.concatenate(
        [xp[:, kh:kh + H, kw:kw + W, :] for kh in range(3) for kw in range(3)],
        axis=-1)                                                  # (N, H, W, 9*Cin)
    patches = _pad_to(patches.reshape(N * HW, K), Kp, 1).astype(compute_dtype)

    # ---- parameter prep: flatten + zero-pad every dim to 128 ----------------
    wc = wconv.reshape(K, Cout)
    wc = _pad_to(_pad_to(wc, Kp, 0), Cp, 1).astype(compute_dtype)
    bc = _pad_to(bconv.reshape(1, Cout), Cp, 1).astype(jnp.float32)
    w1s = _pad_to(_pad_to(w1 / H, Cp, 0), Hidp, 1).astype(compute_dtype)  # fold mean
    b1p = _pad_to(b1.reshape(1, hidden), Hidp, 1).astype(jnp.float32)
    w2p = _pad_to(_pad_to(w2, Hidp, 0), NCp, 1).astype(compute_dtype)
    b2p = _pad_to(b2.reshape(1, nclass), NCp, 1).astype(jnp.float32)

    # ---- batch blocking: >=2 grid points (v7x megacore), rest into matmul M -
    block_n = N // 2 if (N % 2 == 0 and N >= 2) else 1
    grid = (N // block_n,)

    kernel = functools.partial(fused_backbone_neck_head_kernel,
                               nb=block_n, h=H, w=W)

    logits_p = pl.pallas_call(
        kernel,
        out_shape=jax.ShapeDtypeStruct((N * W, NCp), jnp.float32),
        grid=grid,
        in_specs=[
            pl.BlockSpec((block_n * HW, Kp), lambda i: (i, 0)),   # patches
            pl.BlockSpec((Kp, Cp), lambda i: (0, 0)),             # conv weight
            pl.BlockSpec((1, Cp), lambda i: (0, 0)),              # conv bias
            pl.BlockSpec((Cp, Hidp), lambda i: (0, 0)),           # neck FC weight
            pl.BlockSpec((1, Hidp), lambda i: (0, 0)),            # neck FC bias
            pl.BlockSpec((Hidp, NCp), lambda i: (0, 0)),          # CTC weight
            pl.BlockSpec((1, NCp), lambda i: (0, 0)),             # CTC bias
        ],
        out_specs=pl.BlockSpec((block_n * W, NCp), lambda i: (i, 0)),
        compiler_params=pltpu.CompilerParams(
            dimension_semantics=("parallel",)),                   # batch blocks independent
    )(patches, wc, bc, w1s, b1p, w2p, b2p)

    # rows are ordered n*W + w, so a straight reshape recovers (N, W, classes)
    return logits_p.reshape(N, W, NCp)[:, :, :nclass]


# -------------------------- Pure-JAX reference (check) -----------------------
def reference_forward(x_nchw, params):
    wconv, bconv, w1, b1, w2, b2 = params
    x = jnp.transpose(x_nchw, (0, 2, 3, 1))
    feat = jax.lax.conv_general_dilated(
        x, wconv, window_strides=(1, 1), padding="SAME",
        dimension_numbers=("NHWC", "HWIO", "NHWC"))
    feat = jnp.maximum(feat + bconv[0], 0.0)
    seq = jnp.mean(feat, axis=1)                                  # (N, W, Cout)
    h = jnp.maximum(jnp.einsum("nwc,ch->nwh", seq, w1) + b1[0], 0.0)
    return jnp.einsum("nwh,hk->nwk", h, w2) + b2[0]


if __name__ == "__main__":
    # Small shapes consistent with the module's conv-backbone forward.
    N, Cin, H, W = 2, 4, 16, 16
    Cout, hidden, nclass = 32, 32, 37

    key = jax.random.PRNGKey(0)
    k = jax.random.split(key, 7)
    x = jax.random.normal(k[0], (N, Cin, H, W), jnp.float32)      # NCHW input

    # Deterministic parameter init (synthetic; no checkpoint load).
    wconv = 0.1 * jax.random.normal(k[1], (3, 3, Cin, Cout), jnp.float32)  # HWIO
    bconv = 0.1 * jax.random.normal(k[2], (1, Cout), jnp.float32)
    w1 = 0.1 * jax.random.normal(k[3], (Cout, hidden), jnp.float32)
    b1 = 0.1 * jax.random.normal(k[4], (1, hidden), jnp.float32)
    w2 = 0.1 * jax.random.normal(k[5], (hidden, nclass), jnp.float32)
    b2 = 0.1 * jax.random.normal(k[6], (1, nclass), jnp.float32)
    params = (wconv, bconv, w1, b1, w2, b2)

    out = base_model_forward(x, params)                           # f32 path
    out = jax.block_until_ready(out)

    ref = jax.block_until_ready(reference_forward(x, params))
    np.testing.assert_allclose(np.asarray(out), np.asarray(ref),
                               rtol=1e-4, atol=1e-4)
    print("KERNEL_OK")
</pallas_src>

<mosaic_0001>
module attributes {stable_mosaic.version = 11 : i64} {
  func.func @fused_backbone_neck_head_kernel(%arg0: i32, %arg1: memref<256x128xf32, #tpu.memory_space<vmem>>, %arg2: memref<128x128xf32, #tpu.memory_space<vmem>>, %arg3: memref<1x128xf32, #tpu.memory_space<vmem>>, %arg4: memref<128x128xf32, #tpu.memory_space<vmem>>, %arg5: memref<1x128xf32, #tpu.memory_space<vmem>>, %arg6: memref<128x128xf32, #tpu.memory_space<vmem>>, %arg7: memref<1x128xf32, #tpu.memory_space<vmem>>, %arg8: memref<16x128xf32, #tpu.memory_space<vmem>>) attributes {dimension_semantics = [#tpu.dimension_semantics<parallel>], iteration_bounds = array<i64: 2>, scalar_prefetch = 0 : i64, scratch_operands = 0 : i64, tpu.core_type = #tpu.core_type<tc>, window_params = [{transform_indices = @transform_0, window_bounds = array<i64: 256, 128>}, {pipeline_mode = #tpu.pipeline_mode<synchronous>, transform_indices = @transform_1, window_bounds = array<i64: 128, 128>}, {pipeline_mode = #tpu.pipeline_mode<synchronous>, transform_indices = @transform_2, window_bounds = array<i64: 1, 128>}, {pipeline_mode = #tpu.pipeline_mode<synchronous>, transform_indices = @transform_3, window_bounds = array<i64: 128, 128>}, {pipeline_mode = #tpu.pipeline_mode<synchronous>, transform_indices = @transform_4, window_bounds = array<i64: 1, 128>}, {pipeline_mode = #tpu.pipeline_mode<synchronous>, transform_indices = @transform_5, window_bounds = array<i64: 128, 128>}, {pipeline_mode = #tpu.pipeline_mode<synchronous>, transform_indices = @transform_6, window_bounds = array<i64: 1, 128>}, {transform_indices = @transform_7, window_bounds = array<i64: 16, 128>}]} {
    %c0 = arith.constant 0 : index
    %c0_0 = arith.constant 0 : index
    %0 = vector.load %arg1[%c0, %c0_0] : memref<256x128xf32, #tpu.memory_space<vmem>>, vector<256x128xf32>
    %c0_1 = arith.constant 0 : index
    %c0_2 = arith.constant 0 : index
    %1 = vector.load %arg2[%c0_1, %c0_2] : memref<128x128xf32, #tpu.memory_space<vmem>>, vector<128x128xf32>
    %cst = arith.constant dense<0.000000e+00> : vector<256x128xf32>
    %2 = tpu.matmul %0, %1, %cst {dimension_numbers = #tpu.dot_dimension_numbers<[1], [0], [0], [1], [0, 0, 1, 1], [], []>} : vector<256x128xf32>, vector<128x128xf32>, vector<256x128xf32> -> vector<256x128xf32>
    %c0_3 = arith.constant 0 : index
    %c0_4 = arith.constant 0 : index
    %3 = vector.load %arg3[%c0_3, %c0_4] : memref<1x128xf32, #tpu.memory_space<vmem>>, vector<1x128xf32>
    %4 = vector.broadcast %3 : vector<1x128xf32> to vector<256x128xf32>
    %5 = arith.addf %2, %4 : vector<256x128xf32>
    %cst_5 = arith.constant 0.000000e+00 : f32
    %6 = vector.broadcast %cst_5 : f32 to vector<256x128xf32>
    %7 = arith.maximumf %5, %6 : vector<256x128xf32>
    %8 = vector.shape_cast %7 : vector<256x128xf32> to vector<1x16x16x128xf32>
    %cst_6 = arith.constant dense<0.000000e+00> : vector<1x16x128xf32>
    %9 = vector.multi_reduction <add>, %8, %cst_6 [1] : vector<1x16x16x128xf32> to vector<1x16x128xf32>
    %10 = vector.shape_cast %9 : vector<1x16x128xf32> to vector<16x128xf32>
    %c0_7 = arith.constant 0 : index
    %c0_8 = arith.constant 0 : index
    %11 = vector.load %arg4[%c0_7, %c0_8] : memref<128x128xf32, #tpu.memory_space<vmem>>, vector<128x128xf32>
    %cst_9 = arith.constant dense<0.000000e+00> : vector<16x128xf32>
    %12 = tpu.matmul %10, %11, %cst_9 {dimension_numbers = #tpu.dot_dimension_numbers<[1], [0], [0], [1], [0, 0, 1, 1], [], []>} : vector<16x128xf32>, vector<128x128xf32>, vector<16x128xf32> -> vector<16x128xf32>
    %c0_10 = arith.constant 0 : index
    %c0_11 = arith.constant 0 : index
    %13 = vector.load %arg5[%c0_10, %c0_11] : memref<1x128xf32, #tpu.memory_space<vmem>>, vector<1x128xf32>
    %14 = vector.broadcast %13 : vector<1x128xf32> to vector<16x128xf32>
    %15 = arith.addf %12, %14 : vector<16x128xf32>
    %cst_12 = arith.constant 0.000000e+00 : f32
    %16 = vector.broadcast %cst_12 : f32 to vector<16x128xf32>
    %17 = arith.maximumf %15, %16 : vector<16x128xf32>
    %c0_13 = arith.constant 0 : index
    %c0_14 = arith.constant 0 : index
    %18 = vector.load %arg6[%c0_13, %c0_14] : memref<128x128xf32, #tpu.memory_space<vmem>>, vector<128x128xf32>
    %cst_15 = arith.constant dense<0.000000e+00> : vector<16x128xf32>
    %19 = tpu.matmul %17, %18, %cst_15 {dimension_numbers = #tpu.dot_dimension_numbers<[1], [0], [0], [1], [0, 0, 1, 1], [], []>} : vector<16x128xf32>, vector<128x128xf32>, vector<16x128xf32> -> vector<16x128xf32>
    %c0_16 = arith.constant 0 : index
    %c0_17 = arith.constant 0 : index
    %20 = vector.load %arg7[%c0_16, %c0_17] : memref<1x128xf32, #tpu.memory_space<vmem>>, vector<1x128xf32>
    %21 = vector.broadcast %20 : vector<1x128xf32> to vector<16x128xf32>
    %22 = arith.addf %19, %21 : vector<16x128xf32>
    %c0_18 = arith.constant 0 : index
    %c0_19 = arith.constant 0 : index
    %23 = vector.load %arg8[%c0_18, %c0_19] : memref<16x128xf32, #tpu.memory_space<vmem>>, vector<16x128xf32>
    tpu.vector_store %arg8[%c0_18, %c0_19], %22 {strides = array<i32>} : memref<16x128xf32, #tpu.memory_space<vmem>>, vector<16x128xf32>,
    return
  }
  func.func @transform_0(%arg0: i32) -> (i32, i32) {
    %c0_i32 = arith.constant 0 : i32
    %c0_i32_0 = arith.constant 0 : i32
    return %arg0, %c0_i32 : i32, i32
  }
  func.func @transform_1(%arg0: i32) -> (i32, i32) {
    %c0_i32 = arith.constant 0 : i32
    %c0_i32_0 = arith.constant 0 : i32
    %c0_i32_1 = arith.constant 0 : i32
    return %c0_i32, %c0_i32_0 : i32, i32
  }
  func.func @transform_2(%arg0: i32) -> (i32, i32) {
    %c0_i32 = arith.constant 0 : i32
    %c0_i32_0 = arith.constant 0 : i32
    %c0_i32_1 = arith.constant 0 : i32
    return %c0_i32, %c0_i32_0 : i32, i32
  }
  func.func @transform_3(%arg0: i32) -> (i32, i32) {
    %c0_i32 = arith.constant 0 : i32
    %c0_i32_0 = arith.constant 0 : i32
    %c0_i32_1 = arith.constant 0 : i32
    return %c0_i32, %c0_i32_0 : i32, i32
  }
  func.func @transform_4(%arg0: i32) -> (i32, i32) {
    %c0_i32 = arith.constant 0 : i32
    %c0_i32_0 = arith.constant 0 : i32
    %c0_i32_1 = arith.constant 0 : i32
    return %c0_i32, %c0_i32_0 : i32, i32
  }
  func.func @transform_5(%arg0: i32) -> (i32, i32) {
    %c0_i32 = arith.constant 0 : i32
    %c0_i32_0 = arith.constant 0 : i32
    %c0_i32_1 = arith.constant 0 : i32
    return %c0_i32, %c0_i32_0 : i32, i32
  }
  func.func @transform_6(%arg0: i32) -> (i32, i32) {
    %c0_i32 = arith.constant 0 : i32
    %c0_i32_0 = arith.constant 0 : i32
    %c0_i32_1 = arith.constant 0 : i32
    return %c0_i32, %c0_i32_0 : i32, i32
  }
  func.func @transform_7(%arg0: i32) -> (i32, i32) {
    %c0_i32 = arith.constant 0 : i32
    %c0_i32_0 = arith.constant 0 : i32
    return %arg0, %c0_i32 : i32, i32
  }
}

</mosaic_0001>

<bundles_post_ra>
// kernel: tpu_custom_call.1
= control target key start
LH: loop header
LB: loop body
LE: loop exit
PB: predicated region body
PF: predicated region fallthrough
CT: control target
= control target key end

     0   :  { %s1473_s0 = inlined_call_operand.hbm [shape: f32[512,128], index: 0, kind: input, shape index: {}]   ;;  %s1474_s1 = inlined_call_operand.hbm [shape: f32[128,128], index: 1, kind: input, shape index: {}]   ;;  %s1475_s2 = inlined_call_operand.vmem [shape: f32[1,128], index: 2, kind: input, shape index: {}]   ;;  %s1476_s3 = inlined_call_operand.hbm [shape: f32[128,128], index: 3, kind: input, shape index: {}]   ;;  %s1477_s4 = inlined_call_operand.vmem [shape: f32[1,128], index: 4, kind: input, shape index: {}]   ;;  %s1478_s5 = inlined_call_operand.hbm [shape: f32[128,128], index: 5, kind: input, shape index: {}]   ;;  %s1479_s6 = inlined_call_operand.vmem [shape: f32[1,128], index: 6, kind: input, shape index: {}]   ;;  %s1480_s7 = inlined_call_operand.hbm [shape: f32[32,128], index: 7, kind: output, shape index: {}]  }
   0x1   :  { %1483 = sst [smem:[#allocation15_spill]] %s1474_s1 }
   0x2   :  { %12 = vsyncpa [#allocation3], 0 }
   0x3   :  { %14 = vsyncpa [#allocation3 + $0x1], 0 }
   0x4   :  { %15 = vsyncpa [#allocation6], 0 }
   0x5   :  { %16 = vsyncpa [#allocation9], 0 }
   0x6   :  { %17 = vsyncpa [#allocation4], 0 }
   0x7   :  { %19 = vsyncpa [#allocation4 + $0x1], 0  ;;  %s1183_s24 = smov 0   ;;  %s1185_s25 = smov 0  }
   0x8   :  { %s1187_s26 = smov 0   ;;  %s1189_s27 = smov 0  }
   0x9 LB: > { %s1204_s28 = sadd.s32 4294967295, %s1134_s27   ;;  %s786_s29 = sadd.s32 4294967294, %s1134_s27   ;;  %s1134_s27 = sphi %s1189_s27, %s1497_s27   ;;  %s1130_s26 = sphi %s1187_s26, %s1496_s26   ;;  %s1126_s25 = sphi %s1185_s25, %s1495_s25   ;;  %s1122_s24 = sphi %s1183_s24, %s1494_s24  }
   0xa   : > { %p45_p0 = scmp.ne.s32.totalorder %s1126_s25, %s1122_s24  ;;  %p46_p1 = scmp.eq.s32.totalorder %s1204_s28, 0 }
   0xb   : > { %p195_p2 = scmp.eq.s32.totalorder %s1204_s28, 1  ;;  %p201_p3 = scmp.eq.s32.totalorder %s786_s29, 1 }
   0xc   : > { %p1213_p4 = por %p46_p1, %p45_p0  ;;  %p787_p5 = scmp.ge.s32.totalorder %s1134_s27, 1 }
   0xd   : > { %p1218_p6 = por %p201_p3, %p45_p0  ;;  %p208_p7 = scmp.lt.s32.totalorder %s1134_s27, 3 }
   0xe   : > { %s1486_s1 = sld [smem:[#allocation15_spill]]  ;;  %s1136_s13 = smov [#allocation5]  }
   0xf   : > { %p1226_p8 = pnand %p787_p5, %p208_p7  ;;  %s221_s14 = sshll.u32 %s1136_s13, 4  ;;  %s222_s14 = int_to_ptr.vmem [resolvable:$true] %s221_s14 }
  0x10   : > { %s236_s18 = sshll.u32 %s1476_s3, 4  ;;  %s1481_s19 = smov 128   ;;  %s237_s18 = int_to_ptr.hbm [resolvable:$true] %s236_s18 }
  0x11   : > { %p872_p9 = pneg %p1226_p8  ;;  %s1482_s20 = smov 8  }
  0x12   : > { %s1139_s21 = smov [#allocation7]   ;;  %s253_s9 = sshll.u32 %s1478_s5, 4  ;;  %s254_s9 = int_to_ptr.hbm [resolvable:$true] %s253_s9 }
  0x13   : > { %p1234_p10 = pnand %p872_p9, %p46_p1  ;;  %s238_s22 = sshll.u32 %s1139_s21, 4  ;;  %s239_s22 = int_to_ptr.vmem [resolvable:$true] %s238_s22 }
  0x14   : > { %s219_s11 = sshll.u32 %s1486_s1, 4  ;;  %s1140_s10 = smov [#allocation8]   ;;  %s220_s11 = int_to_ptr.hbm [resolvable:$true] %s219_s11 }
  0x15   : > { %875 = dma.hbm_to_vmem [thread:$0]  (!%p1234_p10), %s220_s11, 2048, %s222_s14, [#allocation6], %s1481_s19, %s1481_s19, %s1482_s20  }
  0x16   : > { %878 = dma.hbm_to_vmem [thread:$0]  (!%p1234_p10), %s237_s18, 2048, %s239_s22, [#allocation6], %s1481_s19, %s1481_s19, %s1482_s20  }
  0x17   : > { %s255_s11 = sshll.u32 %s1140_s10, 4  ;;  %s1256_s13 = sadd.s32 1, %s1134_s27   ;;  %s256_s11 = int_to_ptr.vmem [resolvable:$true] %s255_s11 }
  0x18   : > { %881 = dma.hbm_to_vmem [thread:$0]  (!%p1234_p10), %s254_s9, 2048, %s256_s11, [#allocation9], %s1481_s19, %s1481_s19, %s1482_s20  }
  0x19   : > { %s29_s14 = ssub.s32 %s1134_s27, %s1256_s13  ;;  %s32_s16 = sadd.s32 1, %s1130_s26 }
  0x1a   : > { %p30_p12 = scmp.eq.s32.totalorder %s29_s14, 0  ;;  %p39_p13 = scmp.ne.s32.totalorder %s1130_s26, %s1126_s25 }
  0x1b   : > { %p40_p0 = scmp.eq.s32.totalorder %s1134_s27, 0  ;;  %p893_p5 = scmp.lt.s32.totalorder %s1134_s27, 2 }
  0x1c   : > { %s1270_s17 = scalar_select %p30_p12, %s1130_s26, %s32_s16  }
  0x1d   : > { %p1274_p3 = por %p195_p2, %p39_p13  ;;  %s272_s21 = sand.u32 1, %s1130_s26  }
  0x1e   : > { %s806_s15 = sshll.u32 %s1134_s27, 8  ;;  %p41_p7 = por %p40_p0, %p39_p13 }
  0x1f   : > { %s792_s22 = sshll.u32 %s272_s21, 8  ;;  %s281_s9 = scalar_lea.hbm %s1473_s0, %s806_s15 }
  0x20   : > { %s282_s10 = sshll.u32 %s281_s9, 4  ;;  %s276_s11 = scalar_lea.vmem [#allocation2], %s792_s22  ;;  %s283_s10 = int_to_ptr.hbm [resolvable:$true] %s282_s10 }
  0x21   : > { %s284_s14 = sshll.u32 %s276_s11, 4  ;;  %p1284_p9 = pnand %p893_p5, %p41_p7  ;;  %s285_s14 = int_to_ptr.vmem [resolvable:$true] %s284_s14 }
  0x22   : > { %s273_s19 = scalar_lea.sflag [#allocation3], %s272_s21  ;;  %s1030_s20 = sshra.s32 %s283_s10, 4  ;;  %s1031_s20 = int_to_ptr.hbm [resolvable:$true] %s1030_s20 }
  0x23   : > { %s1032_s1 = scalar_lea.hbm %s1031_s20, 256  ;;  %p1034_p10 = pneg %p1284_p9 }
  0x24   : > { %p1033_p2 = scmp.ne.s32.totalorder %s1031_s20, %s1032_s1  ;;  %s1037_s22 = scalar_lea.hbm %s1473_s0, 512 }
  0x25   : > { %p1038_p0 = scmp.lt.s32.totalorder %s1031_s20, %s1473_s0  ;;  %p1039_p5 = scmp.lt.s32.totalorder %s1037_s22, %s1032_s1 }
  0x26   : > { %p1035_p12 = pnand %p1034_p10, %p1033_p2 }
  0x27   : > { %p1040_p7 = por %p1039_p5, %p1038_p0 }
  0x28   : > { %p1036_p13 = pneg %p1035_p12 }
  0x2a   : > { %p1041_p11 = pnand %p1040_p7, %p1036_p13 }
  0x2c   : > { %1044 = shalt.err (!%p1041_p11)
}
  0x2d   : > { %s1491_s21 = smov 8   ;;  %s1492_s11 = smov 128  }
  0x2e   : > { %885 = dma.hbm_to_vmem [thread:$0]  (!%p1284_p9), %s283_s10, 4096, %s285_s14, %s273_s19, %s1492_s11, %s1492_s11, %s1491_s21  }
  0x2f   : > { %296 = sbr.rel (%p1226_p8) target bundleno = 583 (0x247), region = 48  ;;  %s1304_s15 = sand.u32 (!%p1226_p8), 1, %s1126_s25  }
  0x30   : > { %s796_s20 = sshll.u32 (!%p1226_p8), %s1304_s15, 8  ;;  %s299_s1 = scalar_lea.sflag (!%p1226_p8), [#allocation3], %s1304_s15 }
  0x31   : > { %s1308_s23 = scalar_lea.vmem (!%p1226_p8), [#allocation2], %s796_s20 }
  0x34   : > { %1105 = dma.done.wait (%p1213_p4), %s299_s1, 4096  }
  0x35   : > { %1107 = vsyncadd (%p1213_p4), %s299_s1, 4294963200 }
  0x36   : > { %1109 = dma.done.wait (%p46_p1), [#allocation6], 4096  }
  0x37   : > { %1111 = vsyncadd (%p46_p1), [#allocation6], 4294963200 }
  0x38   : > { %1113 = dma.done.wait (%p46_p1), [#allocation9], 2048  }
  0x39   : > { %1115 = vsyncadd (%p46_p1), [#allocation9], 4294965248  ;;  %v398_v0 = vld [vmem:[#allocation5 + $0x78] sm:$0xff]  ;;  %v397_v1 = vld [vmem:[#allocation5 + $0x70] sm:$0xff]  ;;  %s800_s14 = sshll.u32 %s1304_s15, 4  ;;  %s807_s29 = sshll.u32 %s1204_s28, 4 }
  0x3a   : > { %403 = vmatpush.msra.mxu0 %v398_v0  ;;  %810 = vmatpush.msra.mxu3 %v398_v0  ;;  %v396_v2 = vld [vmem:[#allocation5 + $0x68] sm:$0xff]  ;;  %v395_v3 = vld [vmem:[#allocation5 + $0x60] sm:$0xff]  ;;  %v394_v4 = vld [vmem:[#allocation5 + $0x58] sm:$0xff]  ;;  %s680_s11 = scalar_lea.hbm %s1480_s7, %s807_s29  ;;  %s348_s20 = scalar_lea.vmem [#allocation10], %s800_s14 }
  0x3b   : > { %808 = vmatpush.msra.mxu1 %v398_v0  ;;  %809 = vmatpush.msra.mxu2 %v398_v0  ;;  %v393_v5 = vld [vmem:[#allocation5 + $0x50] sm:$0xff]  ;;  %v392_v6 = vld [vmem:[#allocation5 + $0x48] sm:$0xff]  ;;  %v391_v7 = vld [vmem:[#allocation5 + $0x40] sm:$0xff]  ;;  %s681_s1 = sshll.u32 %s348_s20, 4  ;;  %s669_s30 = scalar_lea.sflag [#allocation4], %s1304_s15  ;;  %s682_s1 = int_to_ptr.vmem [resolvable:$true] %s681_s1 }
  0x3c   : > { %404 = vmatpush.msra.mxu0 %v397_v1  ;;  %813 = vmatpush.msra.mxu3 %v397_v1  ;;  %v390_v8 = vld [vmem:[#allocation5 + $0x38] sm:$0xff]  ;;  %v389_v9 = vld [vmem:[#allocation5 + $0x30] sm:$0xff]  ;;  %v388_v10 = vld [vmem:[#allocation5 + $0x28] sm:$0xff]  ;;  %s1080_s14 = scalar_lea.hbm %s1480_s7, 32 }
  0x3d   : > { %811 = vmatpush.msra.mxu1 %v397_v1  ;;  %812 = vmatpush.msra.mxu2 %v397_v1  ;;  %v387_v11 = vld [vmem:[#allocation5 + $0x20] sm:$0xff]  ;;  %v386_v12 = vld [vmem:[#allocation5 + $0x18] sm:$0xff]  ;;  %v385_v13 = vld [vmem:[#allocation5 + $0x10] sm:$0xff] }
  0x3e   : > { %405 = vmatpush.msra.mxu0 %v396_v2  ;;  %816 = vmatpush.msra.mxu3 %v396_v2  ;;  %v384_v14 = vld [vmem:[#allocation5 + $0x8] sm:$0xff]  ;;  %v383_v15 = vld [vmem:[#allocation5] sm:$0xff]  ;;  %v374_v17 = vld [vmem:[%s1308_s23 + $0xb8] sm:$0xff] }
  0x3f   : > { %814 = vmatpush.msra.mxu1 %v396_v2  ;;  %815 = vmatpush.msra.mxu2 %v396_v2  ;;  %v351_v16 = vld [vmem:[%s1308_s23] sm:$0xff]  ;;  %v360_v18 = vld [vmem:[%s1308_s23 + $0x48] sm:$0xff]  ;;  %v361_v22 = vld [vmem:[%s1308_s23 + $0x50] sm:$0xff] }
  0x40   : > { %406 = vmatpush.msra.mxu0 %v395_v3  ;;  %819 = vmatpush.msra.mxu3 %v395_v3  ;;  %v367_v19 = vld [vmem:[%s1308_s23 + $0x80] sm:$0xff]  ;;  %v352_v20 = vld [vmem:[%s1308_s23 + $0x8] sm:$0xff]  ;;  %v353_v24 = vld [vmem:[%s1308_s23 + $0x10] sm:$0xff] }
  0x41   : > { %817 = vmatpush.msra.mxu1 %v395_v3  ;;  %818 = vmatpush.msra.mxu2 %v395_v3  ;;  %v375_v21 = vld [vmem:[%s1308_s23 + $0xc0] sm:$0xff]  ;;  %v368_v23 = vld [vmem:[%s1308_s23 + $0x88] sm:$0xff]  ;;  %v362_v26 = vld [vmem:[%s1308_s23 + $0x58] sm:$0xff] }
  0x42   : > { %407 = vmatpush.msra.mxu0 %v394_v4  ;;  %822 = vmatpush.msra.mxu3 %v394_v4  ;;  %v376_v25 = vld [vmem:[%s1308_s23 + $0xc8] sm:$0xff]  ;;  %v369_v27 = vld [vmem:[%s1308_s23 + $0x90] sm:$0xff]  ;;  %v354_v28 = vld [vmem:[%s1308_s23 + $0x18] sm:$0xff] }
  0x43   : > { %820 = vmatpush.msra.mxu1 %v394_v4  ;;  %821 = vmatpush.msra.mxu2 %v394_v4  ;;  %v377_v29 = vld [vmem:[%s1308_s23 + $0xd0] sm:$0xff]  ;;  %v363_v30 = vld [vmem:[%s1308_s23 + $0x60] sm:$0xff]  ;;  %v370_v31 = vld [vmem:[%s1308_s23 + $0x98] sm:$0xff] }
  0x44   : > { %408 = vmatpush.msra.mxu0 %v393_v5  ;;  %825 = vmatpush.msra.mxu3 %v393_v5  ;;  %v355_v32 = vld [vmem:[%s1308_s23 + $0x20] sm:$0xff]  ;;  %v378_v33 = vld [vmem:[%s1308_s23 + $0xd8] sm:$0xff]  ;;  %v364_v34 = vld [vmem:[%s1308_s23 + $0x68] sm:$0xff] }
  0x45   : > { %823 = vmatpush.msra.mxu1 %v393_v5  ;;  %824 = vmatpush.msra.mxu2 %v393_v5  ;;  %v371_v35 = vld [vmem:[%s1308_s23 + $0xa0] sm:$0xff]  ;;  %v356_v36 = vld [vmem:[%s1308_s23 + $0x28] sm:$0xff]  ;;  %v365_v38 = vld [vmem:[%s1308_s23 + $0x70] sm:$0xff] }
  0x46   : > { %409 = vmatpush.msra.mxu0 %v392_v6  ;;  %828 = vmatpush.msra.mxu3 %v392_v6  ;;  %v379_v37 = vld [vmem:[%s1308_s23 + $0xe0] sm:$0xff]  ;;  %v372_v39 = vld [vmem:[%s1308_s23 + $0xa8] sm:$0xff]  ;;  %v357_v40 = vld [vmem:[%s1308_s23 + $0x30] sm:$0xff] }
  0x47   : > { %826 = vmatpush.msra.mxu1 %v392_v6  ;;  %827 = vmatpush.msra.mxu2 %v392_v6  ;;  %v380_v41 = vld [vmem:[%s1308_s23 + $0xe8] sm:$0xff]  ;;  %v366_v42 = vld [vmem:[%s1308_s23 + $0x78] sm:$0xff]  ;;  %v373_v43 = vld [vmem:[%s1308_s23 + $0xb0] sm:$0xff] }
  0x48   : > { %410 = vmatpush.msra.mxu0 %v391_v7  ;;  %831 = vmatpush.msra.mxu3 %v391_v7  ;;  %v358_v44 = vld [vmem:[%s1308_s23 + $0x38] sm:$0xff]  ;;  %v381_v45 = vld [vmem:[%s1308_s23 + $0xf0] sm:$0xff]  ;;  %v359_v46 = vld [vmem:[%s1308_s23 + $0x40] sm:$0xff] }
  0x49   : > { %829 = vmatpush.msra.mxu1 %v391_v7  ;;  %830 = vmatpush.msra.mxu2 %v391_v7  ;;  %v382_v47 = vld [vmem:[%s1308_s23 + $0xf8] sm:$0xff]  ;;  %v592_v55 = vld [vmem:[#allocation7 + $0x70] sm:$0xff]  ;;  %v591_v56 = vld [vmem:[#allocation7 + $0x68] sm:$0xff]  ;;  %s683_s23 = sshll.u32 %s680_s11, 4  ;;  %s684_s23 = int_to_ptr.hbm [resolvable:$true] %s683_s23 }
  0x4a   : > { %411 = vmatpush.msra.mxu0 %v390_v8  ;;  %834 = vmatpush.msra.mxu3 %v390_v8  ;;  %v593_v50 = vld [vmem:[#allocation7 + $0x78] sm:$0xff]  ;;  %v590_v60 = vld [vmem:[#allocation7 + $0x60] sm:$0xff]  ;;  %v588_v63 = vld [vmem:[#allocation7 + $0x50] sm:$0xff]  ;;  %s1074_s12 = sshra.s32 %s684_s23, 4  ;;  %s1075_s12 = int_to_ptr.hbm [resolvable:$true] %s1074_s12 }
  0x4b   : > { %832 = vmatpush.msra.mxu1 %v390_v8  ;;  %833 = vmatpush.msra.mxu2 %v390_v8  ;;  %v589_v61 = vld [vmem:[#allocation7 + $0x58] sm:$0xff]  ;;  %v587_v3 = vld [vmem:[#allocation7 + $0x48] sm:$0xff]  ;;  %v586_v4 = vld [vmem:[#allocation7 + $0x40] sm:$0xff]  ;;  %s1076_s28 = scalar_lea.hbm %s1075_s12, 16  ;;  %p1081_p11 = scmp.lt.s32.totalorder %s1075_s12, %s1480_s7 }
  0x4c   : > { %412 = vmatpush.msra.mxu0 %v389_v9  ;;  %837 = vmatpush.msra.mxu3 %v389_v9  ;;  %p1077_p1 = scmp.ne.s32.totalorder %s1075_s12, %s1076_s28  ;;  %p1082_p9 = scmp.lt.s32.totalorder %s1080_s14, %s1076_s28 }
  0x4d   : > { %835 = vmatpush.msra.mxu1 %v389_v9  ;;  %836 = vmatpush.msra.mxu2 %v389_v9 }
  0x4e   : > { %413 = vmatpush.msra.mxu0 %v388_v10  ;;  %840 = vmatpush.msra.mxu3 %v388_v10  ;;  %p1078_p4 = pnand %p1077_p1, %p1274_p3  ;;  %p1083_p2 = por %p1082_p9, %p1081_p11 }
  0x4f   : > { %838 = vmatpush.msra.mxu1 %v388_v10  ;;  %839 = vmatpush.msra.mxu2 %v388_v10 }
  0x50   : > { %414 = vmatpush.msra.mxu0 %v387_v11  ;;  %843 = vmatpush.msra.mxu3 %v387_v11  ;;  %p1079_p8 = pneg %p1078_p4 }
  0x51   : > { %841 = vmatpush.msra.mxu1 %v387_v11  ;;  %842 = vmatpush.msra.mxu2 %v387_v11  ;;  %v585_v11 = vld [vmem:[#allocation7 + $0x38] sm:$0xff] }
  0x52   : > { %415 = vmatpush.msra.mxu0 %v386_v12  ;;  %846 = vmatpush.msra.mxu3 %v386_v12  ;;  %p1084_p10 = pnand %p1083_p2, %p1079_p8 }
  0x53   : > { %844 = vmatpush.msra.mxu1 %v386_v12  ;;  %845 = vmatpush.msra.mxu2 %v386_v12  ;;  %v584_v12 = vld [vmem:[#allocation7 + $0x30] sm:$0xff] }
  0x54   : > { %416 = vmatpush.msra.mxu0 %v385_v13  ;;  %849 = vmatpush.msra.mxu3 %v385_v13 }
  0x55   : > { %847 = vmatpush.msra.mxu1 %v385_v13  ;;  %848 = vmatpush.msra.mxu2 %v385_v13  ;;  %v1377_v13 = vld [vmem:[%s1475_s2] ss:$0 sm:$0xff] }
  0x56   : > { %417 = vmatpush.msra.mxu0 %v384_v14  ;;  %852 = vmatpush.msra.mxu3 %v384_v14 }
  0x57   : > { %850 = vmatpush.msra.mxu1 %v384_v14  ;;  %851 = vmatpush.msra.mxu2 %v384_v14 }
  0x58   : > { %418 = vmatpush.msra.mxu0 %v383_v15  ;;  %855 = vmatpush.msra.mxu3 %v383_v15 }
  0x59   : > { %419 = vmatmul.f32.vlgmr.msra.gmra.mxu0 %v351_v16  ;;  %488 = vmatmul.f32.vlgmr.msra.gmra.mxu3 %v374_v17  ;;  %v582_v16 = vld [vmem:[#allocation7 + $0x20] sm:$0xff] }
  0x5a   : > { %853 = vmatpush.msra.mxu1 %v383_v15  ;;  %854 = vmatpush.msra.mxu2 %v383_v15  ;;  %v583_v15 = vld [vmem:[#allocation7 + $0x28] sm:$0xff] }
  0x5b   : > { %446 = vmatmul.f32.vlgmr.msra.gmra.mxu1 %v360_v18  ;;  %467 = vmatmul.f32.vlgmr.msra.gmra.mxu2 %v367_v19 }
  0x5c   : > { %598 = vmatpush.msrb.mxu1 %v593_v50 }
  0x5e   : > { %599 = vmatpush.msrb.mxu1 %v592_v55 }
  0x60   : > { %600 = vmatpush.msrb.mxu1 %v591_v56 }
  0x61   : > { %422 = vmatmul.f32.gmra.mxu0 %v352_v20  ;;  %491 = vmatmul.f32.gmra.mxu3 %v375_v21 }
  0x62   : > { %601 = vmatpush.msrb.mxu1 %v590_v60 }
  0x63   : > { %449 = vmatmul.f32.gmra.mxu1 %v361_v22  ;;  %470 = vmatmul.f32.gmra.mxu2 %v368_v23 }
  0x64   : > { %602 = vmatpush.msrb.mxu1 %v589_v61 }
  0x66   : > { %603 = vmatpush.msrb.mxu1 %v588_v63 }
  0x68   : > { %604 = vmatpush.msrb.mxu1 %v587_v3 }
  0x69   : > { %425 = vmatmul.f32.gmra.mxu0 %v353_v24  ;;  %494 = vmatmul.f32.gmra.mxu3 %v376_v25  ;;  %v581_v24 = vld [vmem:[#allocation7 + $0x18] sm:$0xff] }
  0x6a   : > { %605 = vmatpush.msrb.mxu1 %v586_v4 }
  0x6b   : > { %452 = vmatmul.f32.gmra.mxu1 %v362_v26  ;;  %473 = vmatmul.f32.gmra.mxu2 %v369_v27 }
  0x6c   : > { %606 = vmatpush.msrb.mxu1 %v585_v11 }
  0x6e   : > { %607 = vmatpush.msrb.mxu1 %v584_v12 }
  0x70   : > { %608 = vmatpush.msrb.mxu1 %v583_v15 }
  0x71   : > { %428 = vmatmul.f32.gmra.mxu0 %v354_v28  ;;  %497 = vmatmul.f32.gmra.mxu3 %v377_v29  ;;  %v580_v28 = vld [vmem:[#allocation7 + $0x10] sm:$0xff]  ;;  %v579_v29 = vld [vmem:[#allocation7 + $0x8] sm:$0xff] }
  0x72   : > { %609 = vmatpush.msrb.mxu1 %v582_v16 }
  0x73   : > { %455 = vmatmul.f32.gmra.mxu1 %v363_v30  ;;  %476 = vmatmul.f32.gmra.mxu2 %v370_v31 }
  0x74   : > { %610 = vmatpush.msrb.mxu1 %v581_v24 }
  0x76   : > { %611 = vmatpush.msrb.mxu1 %v580_v28  ;;  %v636_v28 = vld [vmem:[#allocation8 + $0x68] sm:$0xff] }
  0x78   : > { %612 = vmatpush.msrb.mxu1 %v579_v29 }
  0x79   : > { %431 = vmatmul.f32.gmra.mxu0 %v355_v32  ;;  %500 = vmatmul.f32.gmra.mxu3 %v378_v33 }
  0x7b   : > { %458 = vmatmul.f32.gmra.mxu1 %v364_v34  ;;  %479 = vmatmul.f32.gmra.mxu2 %v371_v35 }
  0x81   : > { %434 = vmatmul.f32.gmra.mxu0 %v356_v36  ;;  %503 = vmatmul.f32.gmra.mxu3 %v379_v37  ;;  %v578_v36 = vld [vmem:[#allocation7] sm:$0xff] }
  0x82   : > { %613 = vmatpush.msrb.mxu1 %v578_v36 }
  0x83   : > { %461 = vmatmul.f32.gmra.mxu1 %v365_v38  ;;  %482 = vmatmul.f32.gmra.mxu2 %v372_v39 }
  0x89   : > { %437 = vmatmul.f32.gmra.mxu0 %v357_v40  ;;  %506 = vmatmul.f32.gmra.mxu3 %v380_v41 }
  0x8b   : > { %464 = vmatmul.f32.gmra.mxu1 %v366_v42  ;;  %485 = vmatmul.f32.gmra.mxu2 %v373_v43 }
  0x91   : > { %440 = vmatmul.f32.gmra.mxu0 %v358_v44  ;;  %509 = vmatmul.f32.gmra.mxu3 %v381_v45 }
  0x99   : > { %443 = vmatmul.f32.gmra.mxu0 %v359_v46  ;;  %512 = vmatmul.f32.gmra.mxu3 %v382_v47 }
  0xd6   : > { %v420_v48 = vpop.f32.mrf.mxu0 }
  0xd7   : > { %v421_v30 = vadd.f32 %v1377_v13, %v420_v48 }
  0xd8   : > { %v447_v49 = vpop.f32.mrf.mxu1 }
  0xd9   : > { %v448_v32 = vadd.f32 %v1377_v13, %v447_v49  ;;  %v516_v45 = vmax.f32 %v421_v30, 0.0 }
  0xdb   : > { %v525_v46 = vmax.f32 %v448_v32, 0.0  ;;  %v635_v32 = vld [vmem:[#allocation8 + $0x60] sm:$0xff] }
  0xdc   : > { %v1354_v51 = vpop.f32.mrf.mxu3 }
  0xde   : > { %v423_v52 = vpop.f32.mrf.mxu0  ;;  %v1358_v54 = vpop.f32.mrf.mxu2 }
  0xdf   : > { %v424_v20 = vadd.f32 %v1377_v13, %v423_v52  ;;  %v469_v24 = vadd.f32 %v1377_v13, %v1358_v54 }
  0xe0   : > { %v1356_v53 = vpop.f32.mrf.mxu1 }
  0xe1   : > { %v517_v26 = vmax.f32 %v424_v20, 0.0  ;;  %v451_v60 = vadd.f32 %v1377_v13, %v1356_v53 }
  0xe3   : > { %v526_v16 = vmax.f32 %v451_v60, 0.0 }
  0xe4   : > { %v1360_v58 = vpop.f32.mrf.mxu3 }
  0xe6   : > { %v426_v57 = vpop.f32.mrf.mxu0  ;;  %v1362_v62 = vpop.f32.mrf.mxu2 }
  0xe7   : > { %v427_v25 = vadd.f32 %v1377_v13, %v426_v57  ;;  %v472_v61 = vadd.f32 %v1377_v13, %v1362_v62 }
  0xe8   : > { %v453_v59 = vpop.f32.mrf.mxu1 }
  0xe9   : > { %v518_v37 = vmax.f32 %v427_v25, 0.0  ;;  %v454_v38 = vadd.f32 %v1377_v13, %v453_v59  ;;  %v533_v53 = vmax.f32 %v472_v61, 0.0  ;;  %v630_v61 = vld [vmem:[#allocation8 + $0x38] sm:$0xff] }
  0xeb   : > { %v548_v50 = vadd.f32 %v518_v37, %v516_v45  ;;  %v527_v55 = vmax.f32 %v454_v38, 0.0  ;;  %v634_v38 = vld [vmem:[#allocation8 + $0x58] sm:$0xff] }
  0xec   : > { %v1364_v1 = vpop.f32.mrf.mxu3 }
  0xee   : > { %v429_v0 = vpop.f32.mrf.mxu0  ;;  %v1368_v6 = vpop.f32.mrf.mxu2 }
  0xef   : > { %v430_v19 = vadd.f32 %v1377_v13, %v429_v0 }
  0xf0   : > { %v1366_v2 = vpop.f32.mrf.mxu1 }
  0xf1   : > { %v519_v23 = vmax.f32 %v430_v19, 0.0 }
  0xf3   : > { %v563_v33 = vadd.f32 %v519_v23, %v517_v26  ;;  %v637_v23 = vld [vmem:[#allocation8 + $0x70] sm:$0xff] }
  0xf4   : > { %v1370_v7 = vpop.f32.mrf.mxu3 }
  0xf6   : > { %v432_v5 = vpop.f32.mrf.mxu0  ;;  %v1372_v10 = vpop.f32.mrf.mxu2 }
  0xf7   : > { %v433_v34 = vadd.f32 %v1377_v13, %v432_v5  ;;  %v478_v62 = vadd.f32 %v1377_v13, %v1372_v10  ;;  %v475_v10 = vadd.f32 %v1377_v13, %v1368_v6 }
  0xf8   : > { %v459_v8 = vpop.f32.mrf.mxu1 }
  0xf9   : > { %v460_v43 = vadd.f32 %v1377_v13, %v459_v8  ;;  %v520_v47 = vmax.f32 %v433_v34, 0.0  ;;  %v457_v8 = vadd.f32 %v1377_v13, %v1366_v2  ;;  %v535_v30 = vmax.f32 %v478_v62, 0.0 }
  0xfb   : > { %v529_v57 = vmax.f32 %v460_v43, 0.0  ;;  %v549_v0 = vadd.f32 %v548_v50, %v520_v47  ;;  %v528_v2 = vmax.f32 %v457_v8, 0.0  ;;  %v493_v43 = vadd.f32 %v1377_v13, %v1360_v58 }
  0xfc   : > { %v1379_v14 = vpop.f32.mrf.mxu3  ;;  %v496_v50 = vadd.f32 %v1377_v13, %v1364_v1 }
  0xfd   : > { %v502_v1 = vadd.f32 %v1377_v13, %v1379_v14 }
  0xfe   : > { %v435_v9 = vpop.f32.mrf.mxu0  ;;  %v1384_v22 = vpop.f32.mrf.mxu2 }
  0xff   : > { %v436_v21 = vadd.f32 %v1377_v13, %v435_v9  ;;  %v481_v54 = vadd.f32 %v1377_v13, %v1384_v22 }
 0x100   : > { %v462_v18 = vpop.f32.mrf.mxu1 }
 0x101   : > { %v521_v27 = vmax.f32 %v436_v21, 0.0  ;;  %v463_v11 = vadd.f32 %v1377_v13, %v462_v18  ;;  %v638_v21 = vld [vmem:[#allocation8 + $0x78] sm:$0xff]  ;;  %v536_v22 = vmax.f32 %v481_v54, 0.0 }
 0x102   : > { %643 = vmatpush.msrb.mxu2 %v638_v21  ;;  %v626_v21 = vld [vmem:[#allocation8 + $0x18] sm:$0xff] }
 0x103   : > { %v564_v41 = vadd.f32 %v563_v33, %v521_v27  ;;  %v530_v25 = vmax.f32 %v463_v11, 0.0  ;;  %v532_v33 = vmax.f32 %v469_v24, 0.0  ;;  %v628_v11 = vld [vmem:[#allocation8 + $0x28] sm:$0xff] }
 0x104   : > { %v1392_v39 = vpop.f32.mrf.mxu3  ;;  %644 = vmatpush.msrb.mxu2 %v637_v23  ;;  %v625_v23 = vld [vmem:[#allocation8 + $0x10] sm:$0xff] }
 0x105   : > { %v505_v58 = vadd.f32 %v1377_v13, %v1392_v39 }
 0x106   : > { %v438_v17 = vpop.f32.mrf.mxu0  ;;  %v483_v52 = vpop.f32.mrf.mxu2  ;;  %645 = vmatpush.msrb.mxu2 %v636_v28 }
 0x107   : > { %v439_v42 = vadd.f32 %v1377_v13, %v438_v17  ;;  %v484_v27 = vadd.f32 %v1377_v13, %v483_v52 }
 0x108   : > { %v465_v40 = vpop.f32.mrf.mxu1  ;;  %646 = vmatpush.msrb.mxu2 %v635_v32 }
 0x109   : > { %v466_v49 = vadd.f32 %v1377_v13, %v465_v40  ;;  %v522_v56 = vmax.f32 %v439_v42, 0.0  ;;  %v490_v40 = vadd.f32 %v1377_v13, %v1354_v51  ;;  %v633_v42 = vld [vmem:[#allocation8 + $0x50] sm:$0xff]  ;;  %v499_v51 = vadd.f32 %v1377_v13, %v1370_v7 }
 0x10a   : > { %647 = vmatpush.msrb.mxu2 %v634_v38  ;;  %v629_v7 = vld [vmem:[#allocation8 + $0x30] sm:$0xff] }
 0x10b   : > { %v531_v4 = vmax.f32 %v466_v49, 0.0  ;;  %v550_v9 = vadd.f32 %v549_v0, %v522_v56  ;;  %v539_v49 = vmax.f32 %v490_v40, 0.0  ;;  %v540_v56 = vmax.f32 %v493_v43, 0.0 }
 0x10c   : > { %v1405_v17 = vpop.f32.mrf.mxu3  ;;  %648 = vmatpush.msrb.mxu2 %v633_v42  ;;  %v542_v0 = vmax.f32 %v499_v51, 0.0 }
 0x10d   : > { %v508_v39 = vadd.f32 %v1377_v13, %v1405_v17 }
 0x10e   : > { %v441_v31 = vpop.f32.mrf.mxu0  ;;  %v486_v29 = vpop.f32.mrf.mxu2 }
 0x10f   : > { %v442_v35 = vadd.f32 %v1377_v13, %v441_v31  ;;  %v487_v37 = vadd.f32 %v1377_v13, %v486_v29  ;;  %v545_v62 = vmax.f32 %v508_v39, 0.0 }
 0x111   : > { %v523_v44 = vmax.f32 %v442_v35, 0.0  ;;  %v537_v35 = vmax.f32 %v484_v27, 0.0 }
 0x113   : > { %v565_v48 = vadd.f32 %v564_v41, %v523_v44  ;;  %v534_v41 = vmax.f32 %v475_v10, 0.0 }
 0x114   : > { %v510_v44 = vpop.f32.mrf.mxu3 }
 0x115   : > { %v566_v59 = vadd.f32 %v565_v48, %v525_v46  ;;  %v538_v46 = vmax.f32 %v487_v37, 0.0  ;;  %v632_v48 = vld [vmem:[#allocation8 + $0x48] sm:$0xff] }
 0x116   : > { %v444_v63 = vpop.f32.mrf.mxu0  ;;  %649 = vmatpush.msrb.mxu2 %v632_v48 }
 0x117   : > { %v445_v3 = vadd.f32 %v1377_v13, %v444_v63  ;;  %v567_v5 = vadd.f32 %v566_v59, %v527_v55  ;;  %v631_v55 = vld [vmem:[#allocation8 + $0x40] sm:$0xff]  ;;  %v511_v59 = vadd.f32 %v1377_v13, %v510_v44  ;;  %v541_v63 = vmax.f32 %v496_v50, 0.0 }
 0x118   : > { %650 = vmatpush.msrb.mxu2 %v631_v55 }
 0x119   : > { %v524_v12 = vmax.f32 %v445_v3, 0.0  ;;  %v568_v15 = vadd.f32 %v567_v5, %v529_v57  ;;  %v546_v8 = vmax.f32 %v511_v59, 0.0 }
 0x11a   : > { %651 = vmatpush.msrb.mxu2 %v630_v61 }
 0x11b   : > { %v551_v19 = vadd.f32 %v550_v9, %v524_v12  ;;  %v569_v20 = vadd.f32 %v568_v15, %v531_v4  ;;  %v544_v4 = vmax.f32 %v505_v58, 0.0  ;;  %v543_v15 = vmax.f32 %v502_v1, 0.0 }
 0x11c   : > { %v513_v12 = vpop.f32.mrf.mxu3  ;;  %652 = vmatpush.msrb.mxu2 %v629_v7 }
 0x11d   : > { %v552_v18 = vadd.f32 %v551_v19, %v526_v16  ;;  %v570_v26 = vadd.f32 %v569_v20, %v533_v53  ;;  %v627_v53 = vld [vmem:[#allocation8 + $0x20] sm:$0xff]  ;;  %v514_v14 = vadd.f32 %v1377_v13, %v513_v12 }
 0x11e   : > { %653 = vmatpush.msrb.mxu2 %v628_v11  ;;  %v938_v13 = vld [vmem:[%s1477_s4] ss:$0 sm:$0xff] }
 0x11f   : > { %v553_v31 = vadd.f32 %v552_v18, %v528_v2  ;;  %v571_v36 = vadd.f32 %v570_v26, %v535_v30  ;;  %v547_v17 = vmax.f32 %v514_v14, 0.0  ;;  %v624_v2 = vld [vmem:[#allocation8 + $0x8] sm:$0xff]  ;;  %v623_v18 = vld [vmem:[#allocation8] sm:$0xff] }
 0x120   : > { %654 = vmatpush.msrb.mxu2 %v627_v53 }
 0x121   : > { %v554_v34 = vadd.f32 %v553_v31, %v530_v25  ;;  %v572_v45 = vadd.f32 %v571_v36, %v537_v35  ;;  %v939_v31 = vld [vmem:[%s1479_s6] ss:$0 sm:$0xff] }
 0x122   : > { %655 = vmatpush.msrb.mxu2 %v626_v21 }
 0x123   : > { %v555_v6 = vadd.f32 %v554_v34, %v532_v33  ;;  %v573_v57 = vadd.f32 %v572_v45, %v539_v49 }
 0x124   : > { %656 = vmatpush.msrb.mxu2 %v625_v23 }
 0x125   : > { %v556_v47 = vadd.f32 %v555_v6, %v534_v41  ;;  %v574_v5 = vadd.f32 %v573_v57, %v541_v63 }
 0x126   : > { %657 = vmatpush.msrb.mxu2 %v624_v2 }
 0x127   : > { %v557_v52 = vadd.f32 %v556_v47, %v536_v22  ;;  %v575_v20 = vadd.f32 %v574_v5, %v543_v15 }
 0x128   : > { %658 = vmatpush.msrb.mxu2 %v623_v18 }
 0x129   : > { %v558_v60 = vadd.f32 %v557_v52, %v538_v46  ;;  %v576_v24 = vadd.f32 %v575_v20, %v545_v62 }
 0x12b   : > { %v559_v3 = vadd.f32 %v558_v60, %v540_v56  ;;  %v577_v25 = vadd.f32 %v576_v24, %v547_v17 }
 0x12d   : > { %v560_v9 = vadd.f32 %v559_v3, %v542_v0 }
 0x12f   : > { %v561_v16 = vadd.f32 %v560_v9, %v544_v4 }
 0x131   : > { %v562_v19 = vadd.f32 %v561_v16, %v546_v8 }
 0x133   : > { %614 = vmatmul.f32.vlgmr.msrb.gmra.mxu1 %v562_v19 }
 0x13b   : > { %617 = vmatmul.f32.gmra.mxu1 %v577_v25 }
 0x1b0   : > { %v615_v26 = vpop.f32.mrf.mxu1 }
 0x1b1   : > { %v616_v27 = vadd.f32 %v938_v13, %v615_v26 }
 0x1b3   : > { %v621_v28 = vmax.f32 %v616_v27, 0.0 }
 0x1b5   : > { %659 = vmatmul.f32.vlgmr.msrb.gmra.mxu2 %v621_v28 }
 0x1b8   : > { %v618_v29 = vpop.f32.mrf.mxu1 }
 0x1b9   : > { %v619_v10 = vadd.f32 %v938_v13, %v618_v29 }
 0x1bb   : > { %v622_v30 = vmax.f32 %v619_v10, 0.0 }
 0x1bd   : > { %662 = vmatmul.f32.gmra.mxu2 %v622_v30 }
 0x238   : > { %v660_v32 = vpop.f32.mrf.mxu2 }
 0x239   : > { %v661_v33 = vadd.f32 %v939_v31, %v660_v32 }
 0x23b   : > { %666 = vst [vmem:[%s348_s20] sm:$0xff] %v661_v33 }
 0x240   : > { %v663_v54 = vpop.f32.mrf.mxu2 }
 0x241   : > { %v664_v34 = vadd.f32 %v939_v31, %v663_v54 }
 0x243   : > { %667 = vst [vmem:[%s348_s20 + $0x8] sm:$0xff] %v664_v34 }
 0x244   : > { %1087 = shalt.err (!%p1084_p10)
}
 0x245   : > { %s1141_s15 = smov 128   ;;  %s1142_s29 = smov 8  }
 0x246   : > { %870 = dma.vmem_to_hbm [thread:$0]  (%p1274_p3), %s682_s1, 256, %s684_s23, %s669_s30, %s1141_s15, %s1141_s15, %s1142_s29  }
 0x247 PF: > { %s698_s9 = sand.u32 1, %s1122_s24   ;;  %p1493_p12 = scmp.ge.s32.totalorder %s1134_s27, 2 }
 0x248   : > { %s699_s21 = scalar_lea.sflag [#allocation4], %s698_s9 }
 0x249   : > { %p887_p13 = pnand %p1493_p12, %p1218_p6 }
 0x24b   : > { %p888_p0 = pneg %p887_p13 }
 0x24d   : > { %1117 = dma.done.wait (%p888_p0), %s699_s21, 256  }
 0x24e   : > { %1119 = vsyncadd (%p888_p0), %s699_s21, 4294967040  ;;  %p22_p5 = scmp.ge.s32.totalorder %s1256_s13, 4   ;;  %s1494_s24 = smov %s1126_s25 }
 0x24f   : > { %s1495_s25 = smov %s1130_s26  ;;  %s1496_s26 = smov %s1270_s17 }
 0x250   : > { %s1497_s27 = smov %s1256_s13  ;;  %24 = sbr.rel (!%p22_p5) target bundleno = 9 (0x9), region = 105 }
 0x255   :  { %705 = vsyncpa [#allocation3], 1 }
 0x256   :  { %707 = vsyncpa [#allocation3 + $0x1], 1 }
 0x257   :  { %708 = vsyncpa [#allocation6], 1 }
 0x258   :  { %709 = vsyncpa [#allocation9], 1 }
 0x259   :  { %710 = vsyncpa [#allocation4], 1 }
 0x25a   :  { %712 = vsyncpa [#allocation4 + $0x1], 1 }

</bundles_post_ra>
